<compile_context>
chip_gen: v7x
topology: tpu7x:2x2x1
jax: 0.10.0
libtpu: 0.0.40
codegen_flags: <defaults>
</compile_context>

<pallas_src>
import math

import jax
import jax.numpy as jnp
from jax.experimental import pallas as pl
from jax.experimental.pallas import tpu as pltpu


def _positional_encoding_table(max_len: int, d_model: int) -> jnp.ndarray:
    """Same construction as the torch PositionalEncoding buffer `pe`
    (max_len, d_model); also handles odd d_model (the classic torch recipe
    silently breaks there)."""
    position = jnp.arange(max_len, dtype=jnp.float32)[:, None]
    div_term = jnp.exp(
        jnp.arange(0, d_model, 2, dtype=jnp.float32) * (-math.log(10000.0) / d_model)
    )
    angles = position * div_term  # (max_len, ceil(d_model/2))
    pe = jnp.zeros((max_len, d_model), dtype=jnp.float32)
    pe = pe.at[:, 0::2].set(jnp.sin(angles))
    pe = pe.at[:, 1::2].set(jnp.cos(angles[:, : d_model // 2]))
    return pe


def _encoder_kernel(x_ref, w_ref, add_ref, o_ref):
    # x_ref:   (row_tile, N*C_in)   -- tile of flattened (B*S) rows
    # w_ref:   (N*C_in, N*C_out)    -- block-diagonal kron(I_N, W), resident
    # add_ref: (row_tile, N*C_out)  -- fused bias+node_emb+pe table, resident
    # o_ref:   (row_tile, N*C_out)  -- lane-dense output slab
    y = jnp.dot(x_ref[...], w_ref[...], preferred_element_type=jnp.float32)
    o_ref[...] = (y + add_ref[...]).astype(o_ref.dtype)


def _pick_row_tile(B: int, S: int, target_rows: int = 512) -> int:
    """Row tile = k * S with k | B so (a) the fused add table repeats exactly
    per tile and (b) every grid step is a full tile. Prefer the largest k with
    k*S <= target_rows and k*S a multiple of 8 (sublane constraint); fall back
    to the whole row axis (always legal: block == full dim)."""
    k_max = max(1, target_rows // max(S, 1))
    for k in range(min(B, k_max), 0, -1):
        if B % k == 0 and (k * S) % 8 == 0:
            return k * S
    return B * S


def positional_encoder(x, w, b, node_emb, pe, *, out_dtype=jnp.float32):
    """x: (B, S, N, C_in) f32; w: (C_in, C_out); b: (C_out,);
    node_emb: (N, C_out); pe: (max_len, C_out). Returns (B, S, N, C_out).
    `out_dtype=jnp.bfloat16` halves the dominant HBM write traffic if the
    consumer tolerates it (compute stays f32; cast happens only at the store).
    """
    B, S, N, C_in = x.shape
    C_out = w.shape[1]
    R = B * S                 # flattened (batch, step) rows
    L_in = N * C_in           # fused lane width of the input
    L_out = N * C_out         # fused lane width of the output (lane-dense)

    row_tile = _pick_row_tile(B, S)
    assert R % row_tile == 0 and row_tile % S == 0
    n_tiles = R // row_tile

    # One-time glue in the wrapper (tiny: O(N^2*C_in*C_out) + O(row_tile*L_out)):
    x2 = x.reshape(R, L_in)
    # Block-diagonal weight so the matmul emits lane-dense rows.
    w2 = jnp.kron(jnp.eye(N, dtype=w.dtype), w)                          # (L_in, L_out)
    # Single fused additive table: add[s, n*C_out + c] = b[c] + emb[n,c] + pe[s,c].
    add = (b[None, None, :] + node_emb[None, :, :] + pe[:S, None, :]).reshape(S, L_out)
    add_tile = jnp.tile(add, (row_tile // S, 1))                         # (row_tile, L_out)

    out2 = pl.pallas_call(
        _encoder_kernel,
        out_shape=jax.ShapeDtypeStruct((R, L_out), out_dtype),
        grid_spec=pltpu.PrefetchScalarGridSpec(
            num_scalar_prefetch=0,
            grid=(n_tiles,),
            in_specs=[
                pl.BlockSpec((row_tile, L_in), lambda i: (i, 0)),     # x row tile
                pl.BlockSpec((L_in, L_out), lambda i: (0, 0)),        # weight (resident)
                pl.BlockSpec((row_tile, L_out), lambda i: (0, 0)),    # add table (resident)
            ],
            out_specs=pl.BlockSpec((row_tile, L_out), lambda i: (i, 0)),
        ),
        # VMEM footprint is a few MiB even at 1024-row tiles, well under the
        # default scoped limit on v5e/v6e/v7x, so no vmem_limit_bytes needed.
        compiler_params=pltpu.CompilerParams(
            dimension_semantics=("parallel",)),
    )(x2, w2, add_tile)

    return out2.reshape(B, S, N, C_out)


if __name__ == "__main__":
    # Small shapes consistent with the module: x is [B, S, N, in_channels].
    B, S, N = 2, 8, 4
    in_channels, out_channels = 4, 32
    max_len = 64

    key = jax.random.PRNGKey(0)
    kx, kw, kb, ke = jax.random.split(key, 4)

    x = jax.random.normal(kx, (B, S, N, in_channels), dtype=jnp.float32)

    # Deterministic parameter init (shapes follow nn.Linear / StaticGraphEmbedding).
    lin_bound = 1.0 / math.sqrt(in_channels)
    w = jax.random.uniform(kw, (in_channels, out_channels), jnp.float32,
                           minval=-lin_bound, maxval=lin_bound)
    b = jax.random.uniform(kb, (out_channels,), jnp.float32,
                           minval=-lin_bound, maxval=lin_bound)
    emb_bound = 1.0 / math.sqrt(out_channels)
    node_emb = jax.random.uniform(ke, (N, out_channels), jnp.float32,
                                  minval=-emb_bound, maxval=emb_bound)
    pe = _positional_encoding_table(max_len, out_channels)

    out = positional_encoder(x, w, b, node_emb, pe)
    jax.block_until_ready(out)

    # Pure-JAX reference check of the forward semantics.
    ref = (x @ w + b) + node_emb[None, None, :, :] + pe[:S][None, :, None, :]
    assert out.shape == (B, S, N, out_channels)
    assert jnp.allclose(out, ref, atol=1e-5, rtol=1e-5), "kernel mismatch vs reference"

    print("KERNEL_OK")
</pallas_src>

<mosaic_0001>
module attributes {stable_mosaic.version = 11 : i64} {
  func.func @_encoder_kernel(%arg0: i32, %arg1: memref<16x16xf32, #tpu.memory_space<vmem>>, %arg2: memref<16x128xf32, #tpu.memory_space<vmem>>, %arg3: memref<16x128xf32, #tpu.memory_space<vmem>>, %arg4: memref<16x128xf32, #tpu.memory_space<vmem>>) attributes {dimension_semantics = [#tpu.dimension_semantics<parallel>], iteration_bounds = array<i64: 1>, scalar_prefetch = 0 : i64, scratch_operands = 0 : i64, tpu.core_type = #tpu.core_type<tc>, window_params = [{transform_indices = @transform_0, window_bounds = array<i64: 16, 16>}, {pipeline_mode = #tpu.pipeline_mode<synchronous>, transform_indices = @transform_1, window_bounds = array<i64: 16, 128>}, {pipeline_mode = #tpu.pipeline_mode<synchronous>, transform_indices = @transform_2, window_bounds = array<i64: 16, 128>}, {transform_indices = @transform_3, window_bounds = array<i64: 16, 128>}]} {
    %c0 = arith.constant 0 : index
    %c0_0 = arith.constant 0 : index
    %0 = vector.load %arg1[%c0, %c0_0] : memref<16x16xf32, #tpu.memory_space<vmem>>, vector<16x16xf32>
    %c0_1 = arith.constant 0 : index
    %c0_2 = arith.constant 0 : index
    %1 = vector.load %arg2[%c0_1, %c0_2] : memref<16x128xf32, #tpu.memory_space<vmem>>, vector<16x128xf32>
    %cst = arith.constant dense<0.000000e+00> : vector<16x128xf32>
    %2 = tpu.matmul %0, %1, %cst {dimension_numbers = #tpu.dot_dimension_numbers<[1], [0], [0], [1], [0, 0, 1, 1], [], []>} : vector<16x16xf32>, vector<16x128xf32>, vector<16x128xf32> -> vector<16x128xf32>
    %c0_3 = arith.constant 0 : index
    %c0_4 = arith.constant 0 : index
    %3 = vector.load %arg3[%c0_3, %c0_4] : memref<16x128xf32, #tpu.memory_space<vmem>>, vector<16x128xf32>
    %4 = arith.addf %2, %3 : vector<16x128xf32>
    %c0_5 = arith.constant 0 : index
    %c0_6 = arith.constant 0 : index
    %5 = vector.load %arg4[%c0_5, %c0_6] : memref<16x128xf32, #tpu.memory_space<vmem>>, vector<16x128xf32>
    tpu.vector_store %arg4[%c0_5, %c0_6], %4 {strides = array<i32>} : memref<16x128xf32, #tpu.memory_space<vmem>>, vector<16x128xf32>,
    return
  }
  func.func @transform_0(%arg0: i32) -> (i32, i32) {
    %c0_i32 = arith.constant 0 : i32
    %c0_i32_0 = arith.constant 0 : i32
    return %arg0, %c0_i32 : i32, i32
  }
  func.func @transform_1(%arg0: i32) -> (i32, i32) {
    %c0_i32 = arith.constant 0 : i32
    %c0_i32_0 = arith.constant 0 : i32
    %c0_i32_1 = arith.constant 0 : i32
    return %c0_i32, %c0_i32_0 : i32, i32
  }
  func.func @transform_2(%arg0: i32) -> (i32, i32) {
    %c0_i32 = arith.constant 0 : i32
    %c0_i32_0 = arith.constant 0 : i32
    %c0_i32_1 = arith.constant 0 : i32
    return %c0_i32, %c0_i32_0 : i32, i32
  }
  func.func @transform_3(%arg0: i32) -> (i32, i32) {
    %c0_i32 = arith.constant 0 : i32
    %c0_i32_0 = arith.constant 0 : i32
    return %arg0, %c0_i32 : i32, i32
  }
}

</mosaic_0001>

<bundles_post_ra>
// kernel: tpu_custom_call.1
= control target key start
LH: loop header
LB: loop body
LE: loop exit
PB: predicated region body
PF: predicated region fallthrough
CT: control target
= control target key end

     0   :  { %8 = vsyncpa [#allocation3], 0  ;;  %s374_s0 = inlined_call_operand.hbm [shape: f32[16,16], index: 0, kind: input, shape index: {}]   ;;  %s375_s1 = inlined_call_operand.hbm [shape: f32[16,128], index: 1, kind: input, shape index: {}]   ;;  %s376_s2 = inlined_call_operand.hbm [shape: f32[16,128], index: 2, kind: input, shape index: {}]   ;;  %s377_s3 = inlined_call_operand.hbm [shape: f32[16,128], index: 3, kind: output, shape index: {}]  }
   0x1   :  { %9 = vsyncpa [#allocation6], 0 }
   0x2   :  { %10 = vsyncpa [#allocation4], 0  ;;  %s281_s12 = smov [#allocation5]   ;;  %s282_s14 = smov [#allocation2]  }
   0x3   :  { %s28_s13 = sshll.u32 %s281_s12, 4  ;;  %s16_s15 = sshll.u32 %s282_s14, 4  ;;  %s29_s13 = int_to_ptr.vmem [resolvable:$true] %s28_s13  ;;  %s307_s15 = int_to_ptr.vmem [resolvable:$true] %s16_s15 }
   0x4   :  { %s187_s18 = scalar_lea.hbm %s375_s1, 256 }
   0x5   :  { %p188_p0 = scmp.ne.s32.totalorder %s375_s1, %s187_s18  ;;  %p191_p1 = scmp.lt.u32.totalorder %s187_s18, %s375_s1 }
   0x7   :  { %p193_p2 = pnand %p191_p1, %p188_p0 }
   0x9   :  { %196 = shalt.err (!%p193_p2)
}
   0xa   :  { %s197_s23 = scalar_lea.vmem %s29_s13, 256  ;;  %p202_p4 = scmp.lt.s32.totalorder %s29_s13, %s29_s13 }
   0xb   :  { %p198_p3 = scmp.ne.s32.totalorder %s29_s13, %s197_s23  ;;  %p203_p5 = scmp.lt.s32.totalorder %s197_s23, %s197_s23 }
   0xd   :  { %p204_p6 = por %p203_p5, %p202_p4 }
   0xf   :  { %p205_p7 = pnand %p204_p6, %p198_p3 }
  0x11   :  { %208 = shalt.err (!%p205_p7)
}
  0x12   :  { %s283_s24 = smov 128   ;;  %s284_s25 = smov 8  }
  0x13   :  { %34 = dma.hbm_to_vmem [thread:$0]  %s375_s1, 256, %s29_s13, [#allocation6], %s283_s24, %s283_s24, %s284_s25  }
  0x14   :  { %s209_s30 = scalar_lea.hbm %s374_s0, 256 }
  0x15   :  { %p210_p8 = scmp.ne.s32.totalorder %s374_s0, %s209_s30  ;;  %p213_p9 = scmp.lt.u32.totalorder %s209_s30, %s374_s0 }
  0x17   :  { %p215_p10 = pnand %p213_p9, %p210_p8 }
  0x19   :  { %218 = shalt.err (!%p215_p10)
}
  0x1a   :  { %s219_s8 = scalar_lea.vmem %s307_s15, 256  ;;  %p224_p12 = scmp.lt.s32.totalorder %s307_s15, %s307_s15 }
  0x1b   :  { %p220_p11 = scmp.ne.s32.totalorder %s307_s15, %s219_s8  ;;  %p225_p13 = scmp.lt.s32.totalorder %s219_s8, %s219_s8 }
  0x1d   :  { %p226_p0 = por %p225_p13, %p224_p12 }
  0x1f   :  { %p227_p1 = pnand %p226_p0, %p220_p11 }
  0x21   :  { %230 = shalt.err (!%p227_p1)
}
  0x22   :  { %22 = dma.hbm_to_vmem [thread:$0]  %s374_s0, 256, %s307_s15, [#allocation3], %s283_s24, %s283_s24, %s284_s25  }
  0x23   :  { %s285_s10 = smov [#allocation7]   ;;  %s231_s14 = scalar_lea.hbm %s376_s2, 256 }
  0x24   :  { %s40_s11 = sshll.u32 %s285_s10, 4  ;;  %p232_p2 = scmp.ne.s32.totalorder %s376_s2, %s231_s14  ;;  %s41_s11 = int_to_ptr.vmem [resolvable:$true] %s40_s11 }
  0x25   :  { %p235_p3 = scmp.lt.u32.totalorder %s231_s14, %s376_s2 }
  0x27   :  { %p237_p4 = pnand %p235_p3, %p232_p2 }
  0x29   :  { %240 = shalt.err (!%p237_p4)
}
  0x2a   :  { %s241_s20 = scalar_lea.vmem %s41_s11, 256  ;;  %p246_p6 = scmp.lt.s32.totalorder %s41_s11, %s41_s11 }
  0x2b   :  { %p242_p5 = scmp.ne.s32.totalorder %s41_s11, %s241_s20  ;;  %p247_p7 = scmp.lt.s32.totalorder %s241_s20, %s241_s20 }
  0x2d   :  { %p248_p8 = por %p247_p7, %p246_p6 }
  0x2f   :  { %p249_p9 = pnand %p248_p8, %p242_p5 }
  0x31   :  { %252 = shalt.err (!%p249_p9)
}
  0x32   :  { %46 = dma.hbm_to_vmem [thread:$0]  %s376_s2, 256, %s41_s11, [#allocation6], %s283_s24, %s283_s24, %s284_s25  }
  0x33   :  { %275 = dma.done.wait [#allocation3], 256  }
  0x34   :  { %276 = vsyncadd [#allocation3], 4294967040 }
  0x35   :  { %277 = dma.done.wait [#allocation6], 512  }
  0x36   :  { %278 = vsyncadd [#allocation6], 4294966784  ;;  %vm62_vm0 = vcmask 130048   ;;  %v58_v0 = vld [vmem:[#allocation5] sm:$0xff]  ;;  %v59_v1 = vld [vmem:[#allocation5 + $0x8] sm:$0xff]  ;;  %s286_s21 = smov [#allocation8]  }
  0x37   :  { %v56_v2 = vld [vmem:[#allocation2] sm:$0xff]  ;;  %v177_v3 = vpack.c.bf16 %v59_v1, %v58_v0  ;;  %v57_v4 = vld [vmem:[#allocation2 + $0x8] sm:$0xff]  ;;  %s151_s22 = sshll.u32 %s286_s21, 4  ;;  %s152_s22 = int_to_ptr.vmem [resolvable:$true] %s151_s22 }
  0x38   :  { %174 = vmatprep.mubr.msk.f32.mxu0 %vm62_vm0, %v56_v2  ;;  %v61_v5 = vld [vmem:[#allocation7 + $0x8] sm:$0xff]  ;;  %v60_v6 = vld [vmem:[#allocation7] sm:$0xff]  ;;  %s253_s2 = scalar_lea.vmem %s152_s22, 256  ;;  %p258_p11 = scmp.lt.s32.totalorder %s152_s22, %s152_s22 }
  0x39   :  { %178 = vmatprep.subr.bf16.mxu0 %v177_v3  ;;  %p254_p10 = scmp.ne.s32.totalorder %s152_s22, %s253_s2  ;;  %p259_p12 = scmp.lt.s32.totalorder %s253_s2, %s253_s2 }
  0x3a   :  { %180 = vmatpush3.bf16.msra.mxu0 %v177_v3 }
  0x3b   :  { %p260_p13 = por %p259_p12, %p258_p11 }
  0x3d   :  { %175 = vmatmul.mubr.msk.f32.vlgmr.msra.gmra.mrb[0].mxu0 %vm62_vm0, %v57_v4  ;;  %p261_p0 = pnand %p260_p13, %p254_p10 }
 0x110   :  { %v176_v7 = vpop.f32.mrb[0].mxu0 }
 0x111   :  { %v141_v8 = vadd.f32 %v176_v7, %v61_v5  ;;  %v135_v9 = vpop.f32.mrb[1].mxu0 }
 0x112   :  { %v136_v10 = vadd.f32 %v135_v9, %v60_v6 }
 0x113   :  { %145 = vst [vmem:[#allocation8 + $0x8] sm:$0xff] %v141_v8 }
 0x114   :  { %144 = vst [vmem:[#allocation8] sm:$0xff] %v136_v10 }
 0x115   :  { %264 = shalt.err (!%p261_p0)
}
 0x116   :  { %s265_s27 = scalar_lea.hbm %s377_s3, 256 }
 0x117   :  { %p266_p1 = scmp.ne.s32.totalorder %s377_s3, %s265_s27  ;;  %p269_p2 = scmp.lt.u32.totalorder %s265_s27, %s377_s3 }
 0x119   :  { %p271_p3 = pnand %p269_p2, %p266_p1 }
 0x11b   :  { %274 = shalt.err (!%p271_p3)
}
 0x11c   :  { %157 = dma.vmem_to_hbm [thread:$0]  %s152_s22, 256, %s377_s3, [#allocation4], %s283_s24, %s283_s24, %s284_s25  }
 0x11d   :  { %279 = dma.done.wait [#allocation4], 256  }
 0x11e   :  { %280 = vsyncadd [#allocation4], 4294967040 }
 0x11f   :  { %161 = vsyncpa [#allocation3], 1 }
 0x120   :  { %162 = vsyncpa [#allocation6], 1 }
 0x121   :  { %163 = vsyncpa [#allocation4], 1 }

</bundles_post_ra>
